<compile_context>
chip_gen: v7x
topology: tpu7x:2x2x1
jax: 0.10.0
libtpu: 0.0.40
codegen_flags: <defaults>
</compile_context>

<pallas_src>
import jax
import jax.numpy as jnp
from jax import lax
from jax.experimental import pallas as pl
from jax.experimental.pallas import tpu as pltpu

_LANE = 128
_VMEM_LIMIT = 32 * 1024 * 1024  # safe on v5e/v6e (128 MiB) and v7x (64 MiB physical)


# --------------------------------------------------------------------------- #
# Kernels
# --------------------------------------------------------------------------- #
def _make_mlp_kernel_features_on_lanes(num_layers, compute_dtype):
    """relu(...relu(x @ W0 + b0)...) with activations (tb, D): features on lanes."""

    def kernel(*refs):
        # refs = (x_ref, w0, b0, w1, b1, ..., o_ref)
        x_ref, o_ref = refs[0], refs[-1]
        h = x_ref[...]                                   # (tb, Din) f32
        idx = 1
        for _ in range(num_layers):
            w = refs[idx][...]                           # (Din_l, Dout_l) compute_dtype
            b = refs[idx + 1][...]                       # (1, Dout_l) f32
            idx += 2
            acc = jnp.dot(h.astype(compute_dtype), w,
                          preferred_element_type=jnp.float32)
            h = jnp.maximum(acc + b, 0.0)                # bias/ReLU in f32
        o_ref[...] = h.astype(o_ref.dtype)
        # TODO(synk): train-mode Dropout / batch-statistics BatchNorm are not
        # implemented (eval-mode forward is the deterministic semantics here).

    return kernel


def _make_mlp_kernel_batch_on_lanes(num_layers, compute_dtype):
    """Same math in transposed layout: h_T = relu(W @ x_T + b); batch on 128 lanes."""

    def kernel(*refs):
        # refs = (xT_ref, w0, b0, w1, b1, ..., oT_ref)
        xT_ref, oT_ref = refs[0], refs[-1]
        h = xT_ref[...]                                  # (Din, tb) f32
        idx = 1
        for _ in range(num_layers):
            w = refs[idx][...]                           # (Dout_l, Din_l) compute_dtype
            b = refs[idx + 1][...]                       # (Dout_l, 1) f32
            idx += 2
            acc = jnp.dot(w, h.astype(compute_dtype),
                          preferred_element_type=jnp.float32)   # (Dout_l, tb)
            h = jnp.maximum(acc + b, 0.0)                # bias/ReLU in f32
        oT_ref[...] = h.astype(oT_ref.dtype)

    return kernel


# --------------------------------------------------------------------------- #
# Tiling / wrappers
# --------------------------------------------------------------------------- #
def _pick_tb(B):
    """Batch tile for the batch-on-lanes path.

    Guarantees >=2 grid steps (4 when there is room) on the 'parallel' axis so
    v7x's two TensorCores both get work; 256-aligned; cap raised to 8192 so the
    ~0.35us per-grid-step overhead is amortized on large batches.
    """
    if B < 512:
        return B                       # tiny batch: single step, don't over-tune
    n_steps = 2 if B < 2048 else 4
    tb = -(-B // n_steps)              # cdiv
    tb = max(256, (tb // 256) * 256)
    return min(tb, 8192)


def fused_mlp_forward_small(x, weights, biases, out_dim, *,
                            compute_dtype=jnp.float32):
    """Small-batch path: features on lanes, last layer zero-padded to 128 lanes."""
    B, Din = x.shape
    Dpad = weights[-1].shape[1]        # multiple of 128 -> lane-dense output stores
    tb = B
    grid = (1,)

    in_specs = [pl.BlockSpec((tb, Din), lambda i: (i, 0))]
    operands = [x]
    for w, b in zip(weights, biases):
        # Weights/biases are small and grid-invariant: full blocks, VMEM-resident.
        in_specs.append(pl.BlockSpec(w.shape, lambda i: (0, 0)))
        in_specs.append(pl.BlockSpec(b.shape, lambda i: (0, 0)))
        operands += [w.astype(compute_dtype), b]

    kernel = _make_mlp_kernel_features_on_lanes(len(weights), compute_dtype)
    out = pl.pallas_call(
        kernel,
        out_shape=jax.ShapeDtypeStruct((B, Dpad), x.dtype),
        grid_spec=pl.GridSpec(
            grid=grid,
            in_specs=in_specs,
            out_specs=pl.BlockSpec((tb, Dpad), lambda i: (i, 0)),
        ),
        compiler_params=pltpu.CompilerParams(
            dimension_semantics=("parallel",),
            vmem_limit_bytes=_VMEM_LIMIT),
    )(*operands)
    return out[:, :out_dim]


def fused_mlp_forward_large(x, weights_t, biases_t, *,
                            compute_dtype=jnp.float32, tb=None):
    """Large-batch path: batch on the 128-lane axis (transposed layout)."""
    B, Din = x.shape
    Dout = weights_t[-1].shape[0]
    if tb is None:
        tb = _pick_tb(B)
    grid = (pl.cdiv(B, tb),)

    xT = x.T                                            # (Din, B): one host transpose

    in_specs = [pl.BlockSpec((Din, tb), lambda i: (0, i))]
    operands = [xT]
    for w, b in zip(weights_t, biases_t):
        in_specs.append(pl.BlockSpec(w.shape, lambda i: (0, 0)))
        in_specs.append(pl.BlockSpec(b.shape, lambda i: (0, 0)))
        operands += [w.astype(compute_dtype), b]

    kernel = _make_mlp_kernel_batch_on_lanes(len(weights_t), compute_dtype)
    outT = pl.pallas_call(
        kernel,
        out_shape=jax.ShapeDtypeStruct((Dout, B), x.dtype),
        grid_spec=pl.GridSpec(
            grid=grid,
            in_specs=in_specs,
            # Last dim = tb (multiple of 256 or full B): lane-dense stores.
            out_specs=pl.BlockSpec((Dout, tb), lambda i: (0, i)),
        ),
        compiler_params=pltpu.CompilerParams(
            dimension_semantics=("parallel",),
            vmem_limit_bytes=_VMEM_LIMIT),
    )(*operands)
    return outT.T                                       # back to (B, Dout)


# --------------------------------------------------------------------------- #
# Module
# --------------------------------------------------------------------------- #
class MLPLayerPallas:
    """JAX/Pallas port of MLPLayer(input_dim, hidden_layers, dropout, batch_norm, 'relu')."""

    def __init__(self, input_dim, hidden_layers=(64, 64, 32), eps=1e-5, key=None):
        if key is None:
            key = jax.random.PRNGKey(0)
        self.eps = eps
        self.raw_params = []      # (w, b, gamma, beta, run_mean, run_var) per layer
        ws, bs = [], []
        prev = input_dim
        for h in hidden_layers:
            key, kw, kb, kg, kbeta, km, kv = jax.random.split(key, 7)
            # Linear params (deterministic synthetic init)
            w = jax.random.normal(kw, (prev, h), jnp.float32) * 0.05
            b = jax.random.normal(kb, (1, h), jnp.float32) * 0.01
            # BatchNorm1d params + running stats (eval mode)
            gamma = 1.0 + 0.1 * jax.random.normal(kg, (1, h), jnp.float32)
            beta = 0.05 * jax.random.normal(kbeta, (1, h), jnp.float32)
            run_mean = 0.02 * jax.random.normal(km, (1, h), jnp.float32)
            run_var = 1.0 + 0.1 * jax.random.uniform(kv, (1, h), jnp.float32)
            self.raw_params.append((w, b, gamma, beta, run_mean, run_var))

            # Fold eval-mode BatchNorm into the Linear (host-side, f32, exact math).
            scale = gamma / jnp.sqrt(run_var + eps)     # (1, h)
            ws.append(w * scale)
            bs.append((b - run_mean) * scale + beta)
            prev = h
        self.output_dim = prev

        # Path A (small batch, features on lanes): zero-pad the LAST layer to a
        # multiple of 128 output columns -> unmasked lane-dense stores; padded
        # columns compute relu(0) = 0 and are sliced away in the wrapper.
        self.weights_fl = list(ws)
        self.biases_fl = list(bs)
        pad = (-self.output_dim) % _LANE
        if pad:
            self.weights_fl[-1] = jnp.pad(ws[-1], ((0, 0), (0, pad)))
            self.biases_fl[-1] = jnp.pad(bs[-1], ((0, 0), (0, pad)))

        # Path B (large batch, batch on lanes): transposed weights / column biases.
        self.weights_bl = [w.T for w in ws]             # (Dout, Din)
        self.biases_bl = [b.T for b in bs]              # (Dout, 1)

    def __call__(self, x, compute_dtype=jnp.float32):
        B = x.shape[0]
        if B < 128:
            return fused_mlp_forward_small(
                x, self.weights_fl, self.biases_fl, self.output_dim,
                compute_dtype=compute_dtype)
        return fused_mlp_forward_large(
            x, self.weights_bl, self.biases_bl, compute_dtype=compute_dtype)

    def reference(self, x):
        """Pure-JAX reference of the same eval-mode forward, using the RAW
        (unfolded) Linear + BatchNorm parameters at HIGHEST precision."""
        for (w, b, gamma, beta, mean, var) in self.raw_params:
            y = jnp.dot(x, w, precision=lax.Precision.HIGHEST) + b
            y = (y - mean) / jnp.sqrt(var + self.eps) * gamma + beta
            x = jnp.maximum(y, 0.0)
        return x


if __name__ == "__main__":
    key = jax.random.PRNGKey(0)
    kx1, kx2, kparams = jax.random.split(key, 3)

    input_dim = 32
    hidden_layers = (64, 64, 32)
    mlp = MLPLayerPallas(input_dim, hidden_layers, key=kparams)

    # ---- Small-batch path: features on lanes, lane-dense padded output ------
    x_small = jax.random.normal(kx1, (8, input_dim), jnp.float32)
    out_s = jax.block_until_ready(mlp(x_small))
    ref_s = jax.block_until_ready(mlp.reference(x_small))
    assert out_s.shape == (8, mlp.output_dim)
    assert jnp.allclose(out_s, ref_s, atol=1e-4, rtol=1e-4), (
        float(jnp.max(jnp.abs(out_s - ref_s))))

    # ---- Large-batch path: batch on lanes, >=2 parallel grid steps ----------
    x_large = jax.random.normal(kx2, (512, input_dim), jnp.float32)
    ref_l = jax.block_until_ready(mlp.reference(x_large))

    out_l = jax.block_until_ready(mlp(x_large))                      # f32 MXU operands
    assert out_l.shape == (512, mlp.output_dim)
    assert jnp.allclose(out_l, ref_l, atol=1e-4, rtol=1e-4), (
        float(jnp.max(jnp.abs(out_l - ref_l))))

    out_lb = jax.block_until_ready(mlp(x_large, compute_dtype=jnp.bfloat16))
    assert jnp.allclose(out_lb, ref_l, atol=1e-2, rtol=1e-2), (
        float(jnp.max(jnp.abs(out_lb - ref_l))))

    print("KERNEL_OK")
</pallas_src>

<mosaic_0001>
module attributes {stable_mosaic.version = 11 : i64} {
  func.func @kernel(%arg0: i32, %arg1: memref<8x32xf32, #tpu.memory_space<vmem>>, %arg2: memref<32x64xf32, #tpu.memory_space<vmem>>, %arg3: memref<1x64xf32, #tpu.memory_space<vmem>>, %arg4: memref<64x64xf32, #tpu.memory_space<vmem>>, %arg5: memref<1x64xf32, #tpu.memory_space<vmem>>, %arg6: memref<64x128xf32, #tpu.memory_space<vmem>>, %arg7: memref<1x128xf32, #tpu.memory_space<vmem>>, %arg8: memref<8x128xf32, #tpu.memory_space<vmem>>) attributes {dimension_semantics = [#tpu.dimension_semantics<parallel>], iteration_bounds = array<i64: 1>, scalar_prefetch = 0 : i64, scratch_operands = 0 : i64, tpu.core_type = #tpu.core_type<tc>, window_params = [{transform_indices = @transform_0, window_bounds = array<i64: 8, 32>}, {pipeline_mode = #tpu.pipeline_mode<synchronous>, transform_indices = @transform_1, window_bounds = array<i64: 32, 64>}, {pipeline_mode = #tpu.pipeline_mode<synchronous>, transform_indices = @transform_2, window_bounds = array<i64: 1, 64>}, {pipeline_mode = #tpu.pipeline_mode<synchronous>, transform_indices = @transform_3, window_bounds = array<i64: 64, 64>}, {pipeline_mode = #tpu.pipeline_mode<synchronous>, transform_indices = @transform_4, window_bounds = array<i64: 1, 64>}, {pipeline_mode = #tpu.pipeline_mode<synchronous>, transform_indices = @transform_5, window_bounds = array<i64: 64, 128>}, {pipeline_mode = #tpu.pipeline_mode<synchronous>, transform_indices = @transform_6, window_bounds = array<i64: 1, 128>}, {transform_indices = @transform_7, window_bounds = array<i64: 8, 128>}]} {
    %c0 = arith.constant 0 : index
    %c0_0 = arith.constant 0 : index
    %0 = vector.load %arg1[%c0, %c0_0] : memref<8x32xf32, #tpu.memory_space<vmem>>, vector<8x32xf32>
    %c0_1 = arith.constant 0 : index
    %c0_2 = arith.constant 0 : index
    %1 = vector.load %arg2[%c0_1, %c0_2] : memref<32x64xf32, #tpu.memory_space<vmem>>, vector<32x64xf32>
    %c0_3 = arith.constant 0 : index
    %c0_4 = arith.constant 0 : index
    %2 = vector.load %arg3[%c0_3, %c0_4] : memref<1x64xf32, #tpu.memory_space<vmem>>, vector<1x64xf32>
    %cst = arith.constant dense<0.000000e+00> : vector<8x64xf32>
    %3 = tpu.matmul %0, %1, %cst {dimension_numbers = #tpu.dot_dimension_numbers<[1], [0], [0], [1], [0, 0, 1, 1], [], []>} : vector<8x32xf32>, vector<32x64xf32>, vector<8x64xf32> -> vector<8x64xf32>
    %4 = vector.broadcast %2 : vector<1x64xf32> to vector<8x64xf32>
    %5 = arith.addf %3, %4 : vector<8x64xf32>
    %cst_5 = arith.constant 0.000000e+00 : f32
    %6 = vector.broadcast %cst_5 : f32 to vector<8x64xf32>
    %7 = arith.maximumf %5, %6 : vector<8x64xf32>
    %c0_6 = arith.constant 0 : index
    %c0_7 = arith.constant 0 : index
    %8 = vector.load %arg4[%c0_6, %c0_7] : memref<64x64xf32, #tpu.memory_space<vmem>>, vector<64x64xf32>
    %c0_8 = arith.constant 0 : index
    %c0_9 = arith.constant 0 : index
    %9 = vector.load %arg5[%c0_8, %c0_9] : memref<1x64xf32, #tpu.memory_space<vmem>>, vector<1x64xf32>
    %cst_10 = arith.constant dense<0.000000e+00> : vector<8x64xf32>
    %10 = tpu.matmul %7, %8, %cst_10 {dimension_numbers = #tpu.dot_dimension_numbers<[1], [0], [0], [1], [0, 0, 1, 1], [], []>} : vector<8x64xf32>, vector<64x64xf32>, vector<8x64xf32> -> vector<8x64xf32>
    %11 = vector.broadcast %9 : vector<1x64xf32> to vector<8x64xf32>
    %12 = arith.addf %10, %11 : vector<8x64xf32>
    %cst_11 = arith.constant 0.000000e+00 : f32
    %13 = vector.broadcast %cst_11 : f32 to vector<8x64xf32>
    %14 = arith.maximumf %12, %13 : vector<8x64xf32>
    %c0_12 = arith.constant 0 : index
    %c0_13 = arith.constant 0 : index
    %15 = vector.load %arg6[%c0_12, %c0_13] : memref<64x128xf32, #tpu.memory_space<vmem>>, vector<64x128xf32>
    %c0_14 = arith.constant 0 : index
    %c0_15 = arith.constant 0 : index
    %16 = vector.load %arg7[%c0_14, %c0_15] : memref<1x128xf32, #tpu.memory_space<vmem>>, vector<1x128xf32>
    %cst_16 = arith.constant dense<0.000000e+00> : vector<8x128xf32>
    %17 = tpu.matmul %14, %15, %cst_16 {dimension_numbers = #tpu.dot_dimension_numbers<[1], [0], [0], [1], [0, 0, 1, 1], [], []>} : vector<8x64xf32>, vector<64x128xf32>, vector<8x128xf32> -> vector<8x128xf32>
    %18 = vector.broadcast %16 : vector<1x128xf32> to vector<8x128xf32>
    %19 = arith.addf %17, %18 : vector<8x128xf32>
    %cst_17 = arith.constant 0.000000e+00 : f32
    %20 = vector.broadcast %cst_17 : f32 to vector<8x128xf32>
    %21 = arith.maximumf %19, %20 : vector<8x128xf32>
    %c0_18 = arith.constant 0 : index
    %c0_19 = arith.constant 0 : index
    %22 = vector.load %arg8[%c0_18, %c0_19] : memref<8x128xf32, #tpu.memory_space<vmem>>, vector<8x128xf32>
    tpu.vector_store %arg8[%c0_18, %c0_19], %21 {strides = array<i32>} : memref<8x128xf32, #tpu.memory_space<vmem>>, vector<8x128xf32>,
    return
  }
  func.func @transform_0(%arg0: i32) -> (i32, i32) {
    %c0_i32 = arith.constant 0 : i32
    %c0_i32_0 = arith.constant 0 : i32
    return %arg0, %c0_i32 : i32, i32
  }
  func.func @transform_1(%arg0: i32) -> (i32, i32) {
    %c0_i32 = arith.constant 0 : i32
    %c0_i32_0 = arith.constant 0 : i32
    %c0_i32_1 = arith.constant 0 : i32
    return %c0_i32, %c0_i32_0 : i32, i32
  }
  func.func @transform_2(%arg0: i32) -> (i32, i32) {
    %c0_i32 = arith.constant 0 : i32
    %c0_i32_0 = arith.constant 0 : i32
    %c0_i32_1 = arith.constant 0 : i32
    return %c0_i32, %c0_i32_0 : i32, i32
  }
  func.func @transform_3(%arg0: i32) -> (i32, i32) {
    %c0_i32 = arith.constant 0 : i32
    %c0_i32_0 = arith.constant 0 : i32
    %c0_i32_1 = arith.constant 0 : i32
    return %c0_i32, %c0_i32_0 : i32, i32
  }
  func.func @transform_4(%arg0: i32) -> (i32, i32) {
    %c0_i32 = arith.constant 0 : i32
    %c0_i32_0 = arith.constant 0 : i32
    %c0_i32_1 = arith.constant 0 : i32
    return %c0_i32, %c0_i32_0 : i32, i32
  }
  func.func @transform_5(%arg0: i32) -> (i32, i32) {
    %c0_i32 = arith.constant 0 : i32
    %c0_i32_0 = arith.constant 0 : i32
    %c0_i32_1 = arith.constant 0 : i32
    return %c0_i32, %c0_i32_0 : i32, i32
  }
  func.func @transform_6(%arg0: i32) -> (i32, i32) {
    %c0_i32 = arith.constant 0 : i32
    %c0_i32_0 = arith.constant 0 : i32
    %c0_i32_1 = arith.constant 0 : i32
    return %c0_i32, %c0_i32_0 : i32, i32
  }
  func.func @transform_7(%arg0: i32) -> (i32, i32) {
    %c0_i32 = arith.constant 0 : i32
    %c0_i32_0 = arith.constant 0 : i32
    return %arg0, %c0_i32 : i32, i32
  }
}

</mosaic_0001>

<bundles_post_ra>
// kernel: tpu_custom_call.1
= control target key start
LH: loop header
LB: loop body
LE: loop exit
PB: predicated region body
PF: predicated region fallthrough
CT: control target
= control target key end

     0   :  { %12 = vsyncpa [#allocation3], 0  ;;  %s731_s0 = inlined_call_operand.hbm [shape: f32[8,32], index: 0, kind: input, shape index: {}]   ;;  %s732_s1 = inlined_call_operand.hbm [shape: f32[32,64], index: 1, kind: input, shape index: {}]   ;;  %s733_s2 = inlined_call_operand.vmem [shape: f32[1,64], index: 2, kind: input, shape index: {}]   ;;  %s734_s3 = inlined_call_operand.hbm [shape: f32[64,64], index: 3, kind: input, shape index: {}]   ;;  %s735_s4 = inlined_call_operand.vmem [shape: f32[1,64], index: 4, kind: input, shape index: {}]   ;;  %s736_s5 = inlined_call_operand.hbm [shape: f32[64,128], index: 5, kind: input, shape index: {}]   ;;  %s737_s6 = inlined_call_operand.vmem [shape: f32[1,128], index: 6, kind: input, shape index: {}]   ;;  %s738_s7 = inlined_call_operand.hbm [shape: f32[8,128], index: 7, kind: output, shape index: {}]  }
   0x1   :  { %13 = vsyncpa [#allocation6], 0 }
   0x2   :  { %14 = vsyncpa [#allocation9], 0 }
   0x3   :  { %15 = vsyncpa [#allocation4], 0  ;;  %s600_s24 = smov [#allocation5]   ;;  %s482_s28 = scalar_lea.hbm %s732_s1, 512 }
   0x4   :  { %s31_s25 = sshll.u32 %s600_s24, 4  ;;  %p483_p0 = scmp.ne.s32.totalorder %s732_s1, %s482_s28  ;;  %s32_s25 = int_to_ptr.vmem [resolvable:$true] %s31_s25 }
   0x5   :  { %p486_p1 = scmp.lt.u32.totalorder %s482_s28, %s732_s1 }
   0x7   :  { %p488_p2 = pnand %p486_p1, %p483_p0 }
   0x9   :  { %491 = shalt.err (!%p488_p2)
}
   0xa   :  { %s492_s10 = scalar_lea.vmem %s32_s25, 512  ;;  %p497_p4 = scmp.lt.s32.totalorder %s32_s25, %s32_s25 }
   0xb   :  { %p493_p3 = scmp.ne.s32.totalorder %s32_s25, %s492_s10  ;;  %p498_p5 = scmp.lt.s32.totalorder %s492_s10, %s492_s10 }
   0xd   :  { %p499_p6 = por %p498_p5, %p497_p4 }
   0xf   :  { %p500_p7 = pnand %p499_p6, %p493_p3 }
  0x11   :  { %503 = shalt.err (!%p500_p7)
}
  0x12   :  { %s601_s11 = smov 128   ;;  %s602_s12 = smov 8  }
  0x13   :  { %37 = dma.hbm_to_vmem [thread:$0]  %s732_s1, 512, %s32_s25, [#allocation6], %s601_s11, %s601_s11, %s602_s12  }
  0x14   :  { %s603_s15 = smov [#allocation2]   ;;  %s604_s17 = smov [#allocation7]  }
  0x15   :  { %s22_s16 = sshll.u32 %s603_s15, 4  ;;  %s45_s18 = sshll.u32 %s604_s17, 4  ;;  %s23_s16 = int_to_ptr.vmem [resolvable:$true] %s22_s16  ;;  %s46_s18 = int_to_ptr.vmem [resolvable:$true] %s45_s18 }
  0x16   :  { %s504_s21 = scalar_lea.hbm %s731_s0, 128 }
  0x17   :  { %p505_p8 = scmp.ne.s32.totalorder %s731_s0, %s504_s21  ;;  %p508_p9 = scmp.lt.u32.totalorder %s504_s21, %s731_s0 }
  0x19   :  { %p510_p10 = pnand %p508_p9, %p505_p8 }
  0x1b   :  { %513 = shalt.err (!%p510_p10)
}
  0x1c   :  { %s514_s1 = scalar_lea.vmem %s23_s16, 128  ;;  %p519_p12 = scmp.lt.s32.totalorder %s23_s16, %s23_s16 }
  0x1d   :  { %p515_p11 = scmp.ne.s32.totalorder %s23_s16, %s514_s1  ;;  %p520_p13 = scmp.lt.s32.totalorder %s514_s1, %s514_s1 }
  0x1f   :  { %p521_p0 = por %p520_p13, %p519_p12 }
  0x21   :  { %p522_p1 = pnand %p521_p0, %p515_p11 }
  0x23   :  { %525 = shalt.err (!%p522_p1)
}
  0x24   :  { %25 = dma.hbm_to_vmem [thread:$0]  %s731_s0, 128, %s23_s16, [#allocation3]  }
  0x25   :  { %s526_s30 = scalar_lea.hbm %s734_s3, 1024 }
  0x26   :  { %p527_p2 = scmp.ne.s32.totalorder %s734_s3, %s526_s30  ;;  %p530_p3 = scmp.lt.u32.totalorder %s526_s30, %s734_s3 }
  0x28   :  { %p532_p4 = pnand %p530_p3, %p527_p2 }
  0x2a   :  { %535 = shalt.err (!%p532_p4)
}
  0x2b   :  { %s536_s14 = scalar_lea.vmem %s46_s18, 1024  ;;  %p541_p6 = scmp.lt.s32.totalorder %s46_s18, %s46_s18 }
  0x2c   :  { %p537_p5 = scmp.ne.s32.totalorder %s46_s18, %s536_s14  ;;  %p542_p7 = scmp.lt.s32.totalorder %s536_s14, %s536_s14 }
  0x2e   :  { %p543_p8 = por %p542_p7, %p541_p6 }
  0x30   :  { %p544_p9 = pnand %p543_p8, %p537_p5 }
  0x32   :  { %547 = shalt.err (!%p544_p9)
}
  0x33   :  { %51 = dma.hbm_to_vmem [thread:$0]  %s734_s3, 1024, %s46_s18, [#allocation6], %s601_s11, %s601_s11, %s602_s12  }
  0x34   :  { %s605_s16 = smov [#allocation8]   ;;  %s548_s21 = scalar_lea.hbm %s736_s5, 1024 }
  0x35   :  { %s59_s17 = sshll.u32 %s605_s16, 4  ;;  %p549_p10 = scmp.ne.s32.totalorder %s736_s5, %s548_s21  ;;  %s60_s17 = int_to_ptr.vmem [resolvable:$true] %s59_s17 }
  0x36   :  { %p552_p11 = scmp.lt.u32.totalorder %s548_s21, %s736_s5 }
  0x38   :  { %p554_p12 = pnand %p552_p11, %p549_p10 }
  0x3a   :  { %557 = shalt.err (!%p554_p12)
}
  0x3b   :  { %s558_s1 = scalar_lea.vmem %s60_s17, 1024  ;;  %p563_p0 = scmp.lt.s32.totalorder %s60_s17, %s60_s17 }
  0x3c   :  { %p559_p13 = scmp.ne.s32.totalorder %s60_s17, %s558_s1  ;;  %p564_p1 = scmp.lt.s32.totalorder %s558_s1, %s558_s1 }
  0x3e   :  { %p565_p2 = por %p564_p1, %p563_p0 }
  0x40   :  { %p566_p3 = pnand %p565_p2, %p559_p13 }
  0x42   :  { %569 = shalt.err (!%p566_p3)
}
  0x43   :  { %65 = dma.hbm_to_vmem [thread:$0]  %s736_s5, 1024, %s60_s17, [#allocation9], %s601_s11, %s601_s11, %s602_s12  }
  0x44   :  { %592 = dma.done.wait [#allocation3], 128  }
  0x45   :  { %593 = vsyncadd [#allocation3], 4294967168 }
  0x46   :  { %594 = dma.done.wait [#allocation6], 1536  }
  0x47   :  { %595 = vsyncadd [#allocation6], 4294965760 }
  0x48   :  { %596 = dma.done.wait [#allocation9], 1024  }
  0x49   :  { %597 = vsyncadd [#allocation9], 4294966272  ;;  %v606_v0 = vmov 0.0|0.0   ;;  %vm607_vm0 = vmmov 0   ;;  %v608_v1 = vmov 0.0   ;;  %v81_v2 = vld [vmem:[#allocation5] sm:$0xff] }
  0x4a   :  { %442 = vmatprep.subr.bf16.mxu0 %v606_v0  ;;  %401 = vmatprep.mubr.msk.f32.mxu0 %vm607_vm0, %v608_v1  ;;  %v82_v3 = vld [vmem:[#allocation5 + $0x8] sm:$0xff]  ;;  %v83_v4 = vld [vmem:[#allocation5 + $0x10] sm:$0xff]  ;;  %v84_v6 = vld [vmem:[#allocation5 + $0x18] sm:$0xff]  ;;  %vm92_vm1 = vcmask 261120   ;;  %vm182_vm2 = vcmask 523264   ;;  %s609_s28 = smov [#allocation10]  }
  0x4b   :  { %448 = vmatprep.subr.bf16.mxu1 %v606_v0  ;;  %420 = vmatprep.mubr.msk.f32.mxu1 %vm607_vm0, %v608_v1  ;;  %v443_v5 = vpack.c.bf16 %v82_v3, %v81_v2  ;;  %v167_v7 = vld [vmem:[#allocation7] sm:$0xff]  ;;  %v168_v8 = vld [vmem:[#allocation7 + $0x8] sm:$0xff]  ;;  %v169_v9 = vld [vmem:[#allocation7 + $0x10] sm:$0xff]  ;;  %v446_v11 = vpack.c.bf16 %v84_v6, %v83_v4  ;;  %s353_s29 = sshll.u32 %s609_s28, 4  ;;  %s354_s29 = int_to_ptr.vmem [resolvable:$true] %s353_s29 }
  0x4c   :  { %v170_v10 = vld [vmem:[#allocation7 + $0x18] sm:$0xff]  ;;  %v449_v12 = vpack.c.bf16 %v168_v8, %v167_v7  ;;  %v171_v14 = vld [vmem:[#allocation7 + $0x20] sm:$0xff]  ;;  %v172_v15 = vld [vmem:[#allocation7 + $0x28] sm:$0xff]  ;;  %s570_s30 = scalar_lea.vmem %s354_s29, 128  ;;  %p575_p5 = scmp.lt.s32.totalorder %s354_s29, %s354_s29 }
  0x4d   :  { %444 = vmatpush3.bf16.msra.mxu0 %v443_v5  ;;  %v452_v13 = vpack.c.bf16 %v170_v10, %v169_v9  ;;  %v80_v16 = vld [vmem:[#allocation2] sm:$0xff]  ;;  %v455_v17 = vpack.c.bf16 %v172_v15, %v171_v14  ;;  %v173_v18 = vld [vmem:[#allocation7 + $0x30] sm:$0xff]  ;;  %v257_v21 = vld [vmem:[#allocation8] sm:$0xff]  ;;  %p571_p4 = scmp.ne.s32.totalorder %s354_s29, %s570_s30  ;;  %p576_p6 = scmp.lt.s32.totalorder %s570_s30, %s570_s30 }
  0x4e   :  { %445 = vmatprep.subr.bf16.mxu0 %v606_v0  ;;  %450 = vmatpush3.bf16.msra.mxu1 %v449_v12  ;;  %v174_v19 = vld [vmem:[#allocation7 + $0x38] sm:$0xff]  ;;  %v258_v22 = vld [vmem:[#allocation8 + $0x8] sm:$0xff]  ;;  %v259_v23 = vld [vmem:[#allocation8 + $0x10] sm:$0xff] }
  0x4f   :  { %451 = vmatprep.subr.bf16.mxu1 %v606_v0  ;;  %v458_v20 = vpack.c.bf16 %v174_v19, %v173_v18  ;;  %v461_v24 = vpack.c.bf16 %v258_v22, %v257_v21  ;;  %v260_v25 = vld [vmem:[#allocation8 + $0x18] sm:$0xff]  ;;  %v261_v27 = vld [vmem:[#allocation8 + $0x20] sm:$0xff]  ;;  %v262_v28 = vld [vmem:[#allocation8 + $0x28] sm:$0xff]  ;;  %p577_p7 = por %p576_p6, %p575_p5 }
  0x50   :  { %v464_v26 = vpack.c.bf16 %v260_v25, %v259_v23  ;;  %v467_v29 = vpack.c.bf16 %v262_v28, %v261_v27  ;;  %v364_v30 = vld [vmem:[%s733_s2] ss:$0 sm:$0xff]  ;;  %v263_v35 = vld [vmem:[#allocation8 + $0x30] sm:$0xff] }
  0x51   :  { %447 = vmatpush3.bf16.msra.mxu0 %v446_v11  ;;  %v264_v36 = vld [vmem:[#allocation8 + $0x38] sm:$0xff]  ;;  %p578_p8 = pnand %p577_p7, %p571_p4 }
  0x52   :  { %460 = vmatprep.subr.bf16.mxu0 %v606_v0  ;;  %453 = vmatpush3.bf16.msra.mxu1 %v452_v13  ;;  %v470_v37 = vpack.c.bf16 %v264_v36, %v263_v35  ;;  %v366_v38 = vld [vmem:[%s735_s4] ss:$0 sm:$0xff] }
  0x53   :  { %454 = vmatprep.subr.bf16.mxu1 %v606_v0  ;;  %v368_v43 = vld [vmem:[%s737_s6] ss:$0 sm:$0xff] }
  0x54   :  { %402 = vmatmul.mubr.msk.f32.vlgmr.msra.gmra.mrb[0].mxu0 %vm92_vm1, %v80_v16 }
  0x55   :  { %439 = vmatprep.mubr.msk.f32.mxu0 %vm607_vm0, %v608_v1  ;;  %462 = vmatpush3.bf16.msra.mxu0 %v461_v24 }
  0x56   :  { %456 = vmatpush3.bf16.msra.mxu1 %v455_v17  ;;  %463 = vmatprep.subr.bf16.mxu0 %v606_v0 }
  0x57   :  { %457 = vmatprep.subr.bf16.mxu1 %v606_v0 }
  0x59   :  { %465 = vmatpush3.bf16.msra.mxu0 %v464_v26 }
  0x5a   :  { %459 = vmatpush3.bf16.msra.mxu1 %v458_v20  ;;  %466 = vmatprep.subr.bf16.mxu0 %v606_v0 }
  0x5d   :  { %468 = vmatpush3.bf16.msra.mxu0 %v467_v29 }
  0x5e   :  { %469 = vmatprep.subr.bf16.mxu0 %v606_v0 }
  0x61   :  { %471 = vmatpush3.bf16.msra.mxu0 %v470_v37 }
 0x127   :  { %v162_v31 = vpop.f32.mrb[0].mxu0 }
 0x128   :  { %v163_v32 = vadd.f32 %v364_v30, %v162_v31  ;;  %v403_v33 = vpop.f32.mrb[1].mxu0 }
 0x12a   :  { %v166_v34 = vmax.f32 %v163_v32, 0.0 }
 0x12c   :  { %421 = vmatmul.mubr.msk.f32.vlgmr.msra.gmra.mrb[0].mxu1 %vm182_vm2, %v166_v34 }
 0x1ff   :  { %v252_v39 = vpop.f32.mrb[0].mxu1 }
 0x200   :  { %v253_v40 = vadd.f32 %v366_v38, %v252_v39  ;;  %v422_v41 = vpop.f32.mrb[1].mxu1 }
 0x202   :  { %v256_v42 = vmax.f32 %v253_v40, 0.0 }
 0x204   :  { %440 = vmatmul.mubr.msk.f32.vlgmr.msra.gmra.mrb[2].mxu0 %vm182_vm2, %v256_v42 }
 0x2d7   :  { %v341_v44 = vpop.f32.mrb[2].mxu0 }
 0x2d8   :  { %v342_v45 = vadd.f32 %v368_v43, %v341_v44  ;;  %v441_v46 = vpop.f32.mrb[3].mxu0 }
 0x2da   :  { %v345_v47 = vmax.f32 %v342_v45, 0.0 }
 0x2dc   :  { %346 = vst [vmem:[#allocation10] sm:$0xff] %v345_v47 }
 0x2dd   :  { %581 = shalt.err (!%p578_p8)
}
 0x2de   :  { %s582_s9 = scalar_lea.hbm %s738_s7, 128 }
 0x2df   :  { %p583_p9 = scmp.ne.s32.totalorder %s738_s7, %s582_s9  ;;  %p586_p10 = scmp.lt.u32.totalorder %s582_s9, %s738_s7 }
 0x2e1   :  { %p588_p11 = pnand %p586_p10, %p583_p9 }
 0x2e3   :  { %591 = shalt.err (!%p588_p11)
}
 0x2e4   :  { %356 = dma.vmem_to_hbm [thread:$0]  %s354_s29, 128, %s738_s7, [#allocation4]  }
 0x2e5   :  { %598 = dma.done.wait [#allocation4], 128  }
 0x2e6   :  { %599 = vsyncadd [#allocation4], 4294967168 }
 0x2e7   :  { %360 = vsyncpa [#allocation3], 1 }
 0x2e8   :  { %361 = vsyncpa [#allocation6], 1 }
 0x2e9   :  { %362 = vsyncpa [#allocation9], 1 }
 0x2ea   :  { %363 = vsyncpa [#allocation4], 1 }

</bundles_post_ra>
